<compile_context>
chip_gen: v7x
topology: tpu7x:2x2x1
jax: 0.10.0
libtpu: 0.0.40
codegen_flags: <defaults>
</compile_context>

<pallas_src>
from collections import namedtuple

import jax
import jax.numpy as jnp
from jax.experimental import pallas as pl
from jax.experimental.pallas import tpu as pltpu

Genotype = namedtuple("Genotype", ["normal", "normal_concat"])

# Deterministic synthetic genotype (4 steps, 8 ops, concat of intermediate states 2..5).
GENOTYPE = Genotype(
    normal=[
        ("gcn", 0), ("gcn", 1),
        ("skip_connect", 0), ("gcn", 1),
        ("gcn", 2), ("skip_connect", 1),
        ("gcn", 0), ("skip_connect", 2),
    ],
    normal_concat=[2, 3, 4, 5],
)


# ---------------------------------------------------------------------------
# Graph glue (computed once per graph set, outside the kernel)
# ---------------------------------------------------------------------------
def normalized_adjacency(edge_index, num_nodes):
    src, dst = edge_index[0], edge_index[1]
    a = jnp.zeros((num_nodes, num_nodes), jnp.float32)
    a = a.at[dst, src].add(1.0)                       # message flows src -> dst
    a = a + jnp.eye(num_nodes, dtype=jnp.float32)     # self loops
    deg = a.sum(axis=1)
    d_inv_sqrt = 1.0 / jnp.sqrt(jnp.maximum(deg, 1e-12))
    return d_inv_sqrt[:, None] * a * d_inv_sqrt[None, :]


def pack_block_diag(a_b, graphs_per_block):
    """[B, N, N] per-graph adjacencies -> [B/G, G*N, G*N] block-diagonal slabs."""
    b, n, _ = a_b.shape
    nb = b // graphs_per_block
    blocks = a_b.reshape(nb, graphs_per_block, n, n)
    eye = jnp.eye(graphs_per_block, dtype=a_b.dtype)
    packed = jnp.einsum("bgij,gh->bgihj", blocks, eye)
    return packed.reshape(nb, graphs_per_block * n, graphs_per_block * n)


def _init_linear(key, cin, cout, gain=0.1):
    return gain * jax.random.normal(key, (cin, cout), jnp.float32)


# ---------------------------------------------------------------------------
# Fused, batched cell
# ---------------------------------------------------------------------------
class CellPallas:
    def __init__(self, genotype, c_prev_prev, c_prev, c, key):
        self.C = c
        self.c_prev_prev = c_prev_prev
        self.c_prev = c_prev
        op_names, indices = zip(*genotype.normal)
        self._steps = len(op_names) // 2
        self._concat = list(genotype.normal_concat)
        self._indices = indices
        self._op_names = op_names

        keys = jax.random.split(key, 2 + len(op_names))
        f32, bf16 = jnp.float32, jnp.bfloat16

        # --- preprocess MLPs: Linear(no bias) -> BatchNorm1d (eval identity stats:
        # gamma=1, beta=0, mean=0, var=1) -> ReLU.  BN folded into the weights
        # (shift term is zero for these stats). ---
        eps = 1e-5
        bn_scale = 1.0 / jnp.sqrt(1.0 + eps)
        self._wpre0 = _init_linear(keys[0], c_prev_prev, c) * bn_scale   # f32, for ref
        self._wpre1 = _init_linear(keys[1], c_prev, c) * bn_scale
        # Block-diagonal merged preprocess weight: [s0|s1] @ wpre -> [p0|p1].
        wpre = jnp.zeros((c_prev_prev + c_prev, 2 * c), f32)
        wpre = wpre.at[:c_prev_prev, :c].set(self._wpre0)
        wpre = wpre.at[c_prev_prev:, c:].set(self._wpre1)
        self.wpre = wpre.astype(bf16)

        # --- per-op GCN parameters (f32 copies kept for the pure-JAX reference) ---
        self._per_op_w, self._per_op_b = {}, {}
        for i, name in enumerate(op_names):
            if name == "gcn":
                self._per_op_w[i] = _init_linear(keys[2 + i], c, c)
                self._per_op_b[i] = 0.01 * jnp.ones((1, c), f32)

        # --- "early" GCN ops read preprocessed states 0/1: one propagation dot
        # A @ [p0|p1] and ONE block-diagonal weight dot cover them all. ---
        gcn_ops = [i for i, nm in enumerate(op_names) if nm == "gcn"]
        early_by_state = {0: [], 1: []}
        late_ops = []
        for i in gcn_ops:
            s = indices[i]
            if s in (0, 1):
                early_by_state[s].append(i)
            else:
                late_ops.append(i)

        self._early_col = {}
        n_early = len(early_by_state[0]) + len(early_by_state[1])
        self._n_early = n_early
        if n_early:
            w01 = jnp.zeros((2 * c, n_early * c), f32)
            b01 = jnp.zeros((1, n_early * c), f32)
            col = 0
            for s in (0, 1):
                for op_i in early_by_state[s]:
                    w01 = w01.at[s * c:(s + 1) * c, col:col + c].set(self._per_op_w[op_i])
                    b01 = b01.at[:, col:col + c].set(self._per_op_b[op_i])
                    self._early_col[op_i] = col
                    col += c
            self.w01 = w01.astype(bf16)
            self.b01 = b01                                    # f32 (added post-acc)
        else:
            self.w01, self.b01 = None, None

        # --- "late" GCN ops read intermediate states (>=2): group by source state,
        # weights concatenated so the weight dot runs once per group. ---
        late_groups = {}
        for i in late_ops:
            late_groups.setdefault(indices[i], []).append(i)
        self._late_group_order = sorted(late_groups.keys())
        self._late_w, self._late_b, self._late_slot = [], [], {}
        for sidx in self._late_group_order:
            ws, bs = [], []
            for col, op_i in enumerate(late_groups[sidx]):
                ws.append(self._per_op_w[op_i])
                bs.append(self._per_op_b[op_i])
                self._late_slot[op_i] = (sidx, col * c)
            self._late_w.append(jnp.concatenate(ws, axis=1).astype(bf16))
            self._late_b.append(jnp.concatenate(bs, axis=1))  # f32

    # --- fused kernel body (closure over the static genotype plan) ---
    def _build_kernel(self):
        C = self.C
        steps = self._steps
        indices = self._indices
        op_names = self._op_names
        concat = self._concat
        early_col = dict(self._early_col)
        n_early = self._n_early
        late_order = list(self._late_group_order)
        late_slot = dict(self._late_slot)
        n_late = len(late_order)

        def kernel(a_ref, s_ref, wpre_ref, *rest):
            # rest = ([w01, b01] if any early gcn) + [wg_0, bg_0, ...] + [o_ref]
            pos = 0
            if n_early:
                w01_ref, b01_ref = rest[0], rest[1]
                pos = 2
            late_w = rest[pos:pos + 2 * n_late:2]
            late_b = rest[pos + 1:pos + 2 * n_late:2]
            o_ref = rest[-1]
            f32, bf16 = jnp.float32, jnp.bfloat16

            a = a_ref[...]                                               # [M, M] bf16
            # merged preprocess: [s0|s1] @ blockdiag(Wp0, Wp1), ReLU, f32 acc
            p01 = jnp.maximum(
                jnp.dot(s_ref[...], wpre_ref[...], preferred_element_type=f32), 0.0)
            states = [p01[:, :C], p01[:, C:]]                            # p0, p1 (f32)

            y01 = None
            if n_early:
                # one propagation dot for both preprocessed states ...
                ax01 = jnp.dot(a, p01.astype(bf16), preferred_element_type=f32)
                # ... one block-diagonal weight dot for every early GCN op
                y01 = (jnp.dot(ax01.astype(bf16), w01_ref[...],
                               preferred_element_type=f32) + b01_ref[...])

            ylate = {}  # source state idx -> grouped (A @ state) @ W_group + b_group

            def gcn_out(op_i):
                if op_i in early_col:
                    c0 = early_col[op_i]
                    return y01[:, c0:c0 + C]
                sidx, c0 = late_slot[op_i]
                if sidx not in ylate:
                    g = late_order.index(sidx)
                    ax = jnp.dot(a, states[sidx].astype(bf16),
                                 preferred_element_type=f32)
                    ylate[sidx] = (jnp.dot(ax.astype(bf16), late_w[g][...],
                                           preferred_element_type=f32) + late_b[g][...])
                return ylate[sidx][:, c0:c0 + C]

            def apply_op(op_i):
                name = op_names[op_i]
                if name == "skip_connect":
                    return states[indices[op_i]]          # Identity
                elif name == "gcn":
                    return gcn_out(op_i)
                else:
                    raise ValueError(f"unknown op {name}")

            for i in range(steps):
                # eval mode, drop_prob == 0.0 -> drop_path is a no-op
                states.append(apply_op(2 * i) + apply_op(2 * i + 1))

            out = jnp.concatenate([states[i] for i in concat], axis=1)
            o_ref[...] = out.astype(o_ref.dtype)           # single lane-dense store

        return kernel

    def __call__(self, s01_packed, a_packed):
        """s01_packed: [NB, M, Cpp+Cp] bf16, a_packed: [NB, M, M] bf16 block-diag."""
        nb, m, cin = s01_packed.shape
        cout = len(self._concat) * self.C

        args = [a_packed, s01_packed, self.wpre]
        if self._n_early:
            args += [self.w01, self.b01]
        for w, b in zip(self._late_w, self._late_b):
            args += [w, b]

        in_specs = [
            pl.BlockSpec((None, m, m), lambda b: (b, 0, 0)),       # per-block adjacency
            pl.BlockSpec((None, m, cin), lambda b: (b, 0, 0)),     # per-block features
        ]
        # Weights / biases: constant block index -> stay VMEM-resident across grid.
        for w in args[2:]:
            in_specs.append(pl.BlockSpec(w.shape, lambda b, _nd=w.ndim: (0,) * _nd))

        return pl.pallas_call(
            self._build_kernel(),
            out_shape=jax.ShapeDtypeStruct((nb, m, cout), jnp.float32),
            grid=(nb,),
            in_specs=in_specs,
            out_specs=pl.BlockSpec((None, m, cout), lambda b: (b, 0, 0)),
            compiler_params=pltpu.CompilerParams(
                dimension_semantics=("parallel",)),   # independent super-blocks (2 TCs on v7x)
        )(*args)

    # Pure-JAX single-graph reference (unfused, per-op, f32, A @ (X @ W)).
    def reference_single(self, s0, s1, a_norm):
        p0 = jnp.maximum(s0 @ self._wpre0, 0.0)
        p1 = jnp.maximum(s1 @ self._wpre1, 0.0)
        states = [p0, p1]
        for i in range(self._steps):
            hs = []
            for j in (2 * i, 2 * i + 1):
                name = self._op_names[j]
                x = states[self._indices[j]]
                if name == "skip_connect":
                    hs.append(x)
                else:
                    hs.append(a_norm @ (x @ self._per_op_w[j]) + self._per_op_b[j])
            states.append(hs[0] + hs[1])
        return jnp.concatenate([states[i] for i in self._concat], axis=1)

    def reference(self, s0_b, s1_b, a_b):
        return jax.vmap(self.reference_single)(s0_b, s1_b, a_b)


if __name__ == "__main__":
    N = 16                # nodes per graph
    C_PREV_PREV = 8
    C_PREV = 16
    C = 32
    E = 40                # edges per graph
    GP = 8                # graphs row-stacked per super-block -> M = 128 MXU rows
    B = 16                # total graphs -> grid of B // GP = 2 super-blocks
    NB = B // GP
    M = GP * N

    key = jax.random.PRNGKey(0)
    k_s0, k_s1, k_e, k_cell = jax.random.split(key, 4)

    s0_b = jax.random.normal(k_s0, (B, N, C_PREV_PREV), jnp.float32)
    s1_b = jax.random.normal(k_s1, (B, N, C_PREV), jnp.float32)
    edge_index = jax.random.randint(k_e, (B, 2, E), 0, N, dtype=jnp.int32)

    cell = CellPallas(GENOTYPE, C_PREV_PREV, C_PREV, C, k_cell)

    # Adjacency depends only on the graphs -> normalize + block-diag pack once.
    a_b = jax.vmap(normalized_adjacency, in_axes=(0, None))(edge_index, N)
    a_packed = pack_block_diag(a_b, GP).astype(jnp.bfloat16)

    @jax.jit
    def forward(s0_, s1_, a_packed_):
        s01 = jnp.concatenate([s0_, s1_], axis=-1)             # [B, N, Cpp+Cp]
        s01 = s01.reshape(NB, M, C_PREV_PREV + C_PREV).astype(jnp.bfloat16)
        out = cell(s01, a_packed_)                              # [NB, M, 4C]
        return out.reshape(B, N, -1)

    out = jax.block_until_ready(forward(s0_b, s1_b, a_packed))

    assert out.shape == (B, N, len(GENOTYPE.normal_concat) * C), out.shape
    assert jnp.all(jnp.isfinite(out))

    ref = cell.reference(s0_b, s1_b, a_b)
    # bf16 operands on 3 chained dots + (A@X)@W reorder vs A@(X@W) -> loosened tol.
    assert jnp.allclose(out, ref, rtol=5e-2, atol=5e-2), (
        float(jnp.max(jnp.abs(out - ref))))

    print("KERNEL_OK")
</pallas_src>

<mosaic_0001>
module attributes {stable_mosaic.version = 11 : i64} {
  func.func @kernel(%arg0: i32, %arg1: memref<1x128x128xbf16, #tpu.memory_space<vmem>>, %arg2: memref<1x128x24xbf16, #tpu.memory_space<vmem>>, %arg3: memref<24x64xbf16, #tpu.memory_space<vmem>>, %arg4: memref<64x128xbf16, #tpu.memory_space<vmem>>, %arg5: memref<1x128xf32, #tpu.memory_space<vmem>>, %arg6: memref<32x32xbf16, #tpu.memory_space<vmem>>, %arg7: memref<1x32xf32, #tpu.memory_space<vmem>>, %arg8: memref<1x128x128xf32, #tpu.memory_space<vmem>>) attributes {dimension_semantics = [#tpu.dimension_semantics<parallel>], iteration_bounds = array<i64: 2>, scalar_prefetch = 0 : i64, scratch_operands = 0 : i64, tpu.core_type = #tpu.core_type<tc>, window_params = [{transform_indices = @transform_0, window_bounds = array<i64: 1, 128, 128>}, {transform_indices = @transform_1, window_bounds = array<i64: 1, 128, 24>}, {pipeline_mode = #tpu.pipeline_mode<synchronous>, transform_indices = @transform_2, window_bounds = array<i64: 24, 64>}, {pipeline_mode = #tpu.pipeline_mode<synchronous>, transform_indices = @transform_3, window_bounds = array<i64: 64, 128>}, {pipeline_mode = #tpu.pipeline_mode<synchronous>, transform_indices = @transform_4, window_bounds = array<i64: 1, 128>}, {pipeline_mode = #tpu.pipeline_mode<synchronous>, transform_indices = @transform_5, window_bounds = array<i64: 32, 32>}, {pipeline_mode = #tpu.pipeline_mode<synchronous>, transform_indices = @transform_6, window_bounds = array<i64: 1, 32>}, {transform_indices = @transform_7, window_bounds = array<i64: 1, 128, 128>}]} {
    %c0 = arith.constant 0 : index
    %c0_0 = arith.constant 0 : index
    %c0_1 = arith.constant 0 : index
    %0 = vector.load %arg1[%c0, %c0_0, %c0_1] : memref<1x128x128xbf16, #tpu.memory_space<vmem>>, vector<1x128x128xbf16>
    %1 = vector.shape_cast %0 : vector<1x128x128xbf16> to vector<128x128xbf16>
    %c0_2 = arith.constant 0 : index
    %c0_3 = arith.constant 0 : index
    %c0_4 = arith.constant 0 : index
    %2 = vector.load %arg2[%c0_2, %c0_3, %c0_4] : memref<1x128x24xbf16, #tpu.memory_space<vmem>>, vector<1x128x24xbf16>
    %3 = vector.shape_cast %2 : vector<1x128x24xbf16> to vector<128x24xbf16>
    %c0_5 = arith.constant 0 : index
    %c0_6 = arith.constant 0 : index
    %4 = vector.load %arg3[%c0_5, %c0_6] : memref<24x64xbf16, #tpu.memory_space<vmem>>, vector<24x64xbf16>
    %cst = arith.constant dense<0.000000e+00> : vector<128x64xf32>
    %5 = tpu.matmul %3, %4, %cst {dimension_numbers = #tpu.dot_dimension_numbers<[1], [0], [0], [1], [0, 0, 1, 1], [], []>} : vector<128x24xbf16>, vector<24x64xbf16>, vector<128x64xf32> -> vector<128x64xf32>
    %cst_7 = arith.constant 0.000000e+00 : f32
    %6 = vector.broadcast %cst_7 : f32 to vector<128x64xf32>
    %7 = arith.maximumf %5, %6 : vector<128x64xf32>
    %8 = vector.extract_strided_slice %7 {offsets = [0, 0], sizes = [128, 32], strides = [1, 1]} : vector<128x64xf32> to vector<128x32xf32>
    %9 = vector.extract_strided_slice %7 {offsets = [0, 32], sizes = [128, 32], strides = [1, 1]} : vector<128x64xf32> to vector<128x32xf32>
    %10 = arith.truncf %7 : vector<128x64xf32> to vector<128x64xbf16>
    %cst_8 = arith.constant dense<0.000000e+00> : vector<128x64xf32>
    %11 = tpu.matmul %1, %10, %cst_8 {dimension_numbers = #tpu.dot_dimension_numbers<[1], [0], [0], [1], [0, 0, 1, 1], [], []>} : vector<128x128xbf16>, vector<128x64xbf16>, vector<128x64xf32> -> vector<128x64xf32>
    %12 = arith.truncf %11 : vector<128x64xf32> to vector<128x64xbf16>
    %c0_9 = arith.constant 0 : index
    %c0_10 = arith.constant 0 : index
    %13 = vector.load %arg4[%c0_9, %c0_10] : memref<64x128xbf16, #tpu.memory_space<vmem>>, vector<64x128xbf16>
    %cst_11 = arith.constant dense<0.000000e+00> : vector<128x128xf32>
    %14 = tpu.matmul %12, %13, %cst_11 {dimension_numbers = #tpu.dot_dimension_numbers<[1], [0], [0], [1], [0, 0, 1, 1], [], []>} : vector<128x64xbf16>, vector<64x128xbf16>, vector<128x128xf32> -> vector<128x128xf32>
    %c0_12 = arith.constant 0 : index
    %c0_13 = arith.constant 0 : index
    %15 = vector.load %arg5[%c0_12, %c0_13] : memref<1x128xf32, #tpu.memory_space<vmem>>, vector<1x128xf32>
    %16 = vector.broadcast %15 : vector<1x128xf32> to vector<128x128xf32>
    %17 = arith.addf %14, %16 : vector<128x128xf32>
    %18 = vector.extract_strided_slice %17 {offsets = [0, 0], sizes = [128, 32], strides = [1, 1]} : vector<128x128xf32> to vector<128x32xf32>
    %19 = vector.extract_strided_slice %17 {offsets = [0, 64], sizes = [128, 32], strides = [1, 1]} : vector<128x128xf32> to vector<128x32xf32>
    %20 = arith.addf %18, %19 : vector<128x32xf32>
    %21 = vector.extract_strided_slice %17 {offsets = [0, 96], sizes = [128, 32], strides = [1, 1]} : vector<128x128xf32> to vector<128x32xf32>
    %22 = arith.addf %8, %21 : vector<128x32xf32>
    %23 = arith.truncf %20 : vector<128x32xf32> to vector<128x32xbf16>
    %cst_14 = arith.constant dense<0.000000e+00> : vector<128x32xf32>
    %24 = tpu.matmul %1, %23, %cst_14 {dimension_numbers = #tpu.dot_dimension_numbers<[1], [0], [0], [1], [0, 0, 1, 1], [], []>} : vector<128x128xbf16>, vector<128x32xbf16>, vector<128x32xf32> -> vector<128x32xf32>
    %25 = arith.truncf %24 : vector<128x32xf32> to vector<128x32xbf16>
    %c0_15 = arith.constant 0 : index
    %c0_16 = arith.constant 0 : index
    %26 = vector.load %arg6[%c0_15, %c0_16] : memref<32x32xbf16, #tpu.memory_space<vmem>>, vector<32x32xbf16>
    %cst_17 = arith.constant dense<0.000000e+00> : vector<128x32xf32>
    %27 = tpu.matmul %25, %26, %cst_17 {dimension_numbers = #tpu.dot_dimension_numbers<[1], [0], [0], [1], [0, 0, 1, 1], [], []>} : vector<128x32xbf16>, vector<32x32xbf16>, vector<128x32xf32> -> vector<128x32xf32>
    %c0_18 = arith.constant 0 : index
    %c0_19 = arith.constant 0 : index
    %28 = vector.load %arg7[%c0_18, %c0_19] : memref<1x32xf32, #tpu.memory_space<vmem>>, vector<1x32xf32>
    %29 = vector.broadcast %28 : vector<1x32xf32> to vector<128x32xf32>
    %30 = arith.addf %27, %29 : vector<128x32xf32>
    %31 = arith.addf %30, %9 : vector<128x32xf32>
    %32 = vector.extract_strided_slice %17 {offsets = [0, 32], sizes = [128, 32], strides = [1, 1]} : vector<128x128xf32> to vector<128x32xf32>
    %33 = arith.addf %32, %20 : vector<128x32xf32>
    %34 = tpu.concatenate %20, %22, %31, %33 in 1 : vector<128x32xf32>, vector<128x32xf32>, vector<128x32xf32>, vector<128x32xf32> -> vector<128x128xf32>
    %c0_20 = arith.constant 0 : index
    %c0_21 = arith.constant 0 : index
    %c0_22 = arith.constant 0 : index
    %35 = vector.load %arg8[%c0_20, %c0_21, %c0_22] : memref<1x128x128xf32, #tpu.memory_space<vmem>>, vector<1x128x128xf32>
    %36 = vector.shape_cast %35 : vector<1x128x128xf32> to vector<128x128xf32>
    %37 = vector.shape_cast %34 : vector<128x128xf32> to vector<1x128x128xf32>
    tpu.vector_store %arg8[%c0_20, %c0_21, %c0_22], %37 {strides = array<i32>} : memref<1x128x128xf32, #tpu.memory_space<vmem>>, vector<1x128x128xf32>,
    return
  }
  func.func @transform_0(%arg0: i32) -> (i32, i32, i32) {
    %c0_i32 = arith.constant 0 : i32
    %c0_i32_0 = arith.constant 0 : i32
    %c0_i32_1 = arith.constant 0 : i32
    return %arg0, %c0_i32, %c0_i32_0 : i32, i32, i32
  }
  func.func @transform_1(%arg0: i32) -> (i32, i32, i32) {
    %c0_i32 = arith.constant 0 : i32
    %c0_i32_0 = arith.constant 0 : i32
    %c0_i32_1 = arith.constant 0 : i32
    return %arg0, %c0_i32, %c0_i32_0 : i32, i32, i32
  }
  func.func @transform_2(%arg0: i32) -> (i32, i32) {
    %c0_i32 = arith.constant 0 : i32
    %c0_i32_0 = arith.constant 0 : i32
    %c0_i32_1 = arith.constant 0 : i32
    return %c0_i32, %c0_i32_0 : i32, i32
  }
  func.func @transform_3(%arg0: i32) -> (i32, i32) {
    %c0_i32 = arith.constant 0 : i32
    %c0_i32_0 = arith.constant 0 : i32
    %c0_i32_1 = arith.constant 0 : i32
    return %c0_i32, %c0_i32_0 : i32, i32
  }
  func.func @transform_4(%arg0: i32) -> (i32, i32) {
    %c0_i32 = arith.constant 0 : i32
    %c0_i32_0 = arith.constant 0 : i32
    %c0_i32_1 = arith.constant 0 : i32
    return %c0_i32, %c0_i32_0 : i32, i32
  }
  func.func @transform_5(%arg0: i32) -> (i32, i32) {
    %c0_i32 = arith.constant 0 : i32
    %c0_i32_0 = arith.constant 0 : i32
    %c0_i32_1 = arith.constant 0 : i32
    return %c0_i32, %c0_i32_0 : i32, i32
  }
  func.func @transform_6(%arg0: i32) -> (i32, i32) {
    %c0_i32 = arith.constant 0 : i32
    %c0_i32_0 = arith.constant 0 : i32
    %c0_i32_1 = arith.constant 0 : i32
    return %c0_i32, %c0_i32_0 : i32, i32
  }
  func.func @transform_7(%arg0: i32) -> (i32, i32, i32) {
    %c0_i32 = arith.constant 0 : i32
    %c0_i32_0 = arith.constant 0 : i32
    %c0_i32_1 = arith.constant 0 : i32
    return %arg0, %c0_i32, %c0_i32_0 : i32, i32, i32
  }
}

</mosaic_0001>

<bundles_post_ra>
// kernel: forward.1
= control target key start
LH: loop header
LB: loop body
LE: loop exit
PB: predicated region body
PF: predicated region fallthrough
CT: control target
= control target key end

     0   :  { %12 = vsyncpa [#allocation3], 0  ;;  %s2930_s0 = inlined_call_operand.vmem [shape: bf16[2,128,128], index: 0, kind: input, shape index: {}]   ;;  %s2931_s1 = inlined_call_operand.vmem [shape: bf16[2,128,24], index: 1, kind: input, shape index: {}]   ;;  %s2932_s2 = inlined_call_operand.vmem [shape: bf16[24,64], index: 2, kind: input, shape index: {}]   ;;  %s2933_s3 = inlined_call_operand.vmem [shape: bf16[64,128], index: 3, kind: input, shape index: {}]   ;;  %s2934_s4 = inlined_call_operand.vmem [shape: f32[1,128], index: 4, kind: input, shape index: {}]   ;;  %s2935_s5 = inlined_call_operand.vmem [shape: bf16[32,32], index: 5, kind: input, shape index: {}]   ;;  %s2936_s6 = inlined_call_operand.vmem [shape: f32[1,32], index: 6, kind: input, shape index: {}]   ;;  %s2937_s7 = inlined_call_operand.hbm [shape: f32[2,128,128], index: 7, kind: output, shape index: {}]  }
   0x1   :  { %14 = vsyncpa [#allocation3 + $0x1], 0  ;;  %s2191_s24 = smov 0   ;;  %s2193_s25 = smov 0  }
   0x2   :  { %s2195_s26 = smov 0   ;;  %s2197_s27 = smov 0  }
   0x3 LB: > { %s2212_s28 = sadd.s32 4294967295, %s2143_s27   ;;  %s1753_s29 = sadd.s32 4294967294, %s2143_s27   ;;  %s2143_s27 = sphi %s2197_s27, %s2946_s27   ;;  %s2139_s26 = sphi %s2195_s26, %s2945_s26   ;;  %s2135_s25 = sphi %s2193_s25, %s2944_s25   ;;  %s2131_s24 = sphi %s2191_s24, %s2943_s24  }
   0x4   : > { %s2216_s30 = sadd.s32 1, %s2143_s27   ;;  %s184_s8 = sadd.s32 1, %s2139_s26 }
   0x5   : > { %s181_s9 = ssub.s32 %s2143_s27, %s2216_s30  ;;  %p194_p0 = scmp.ne.s32.totalorder %s2139_s26, %s2135_s25 }
   0x6   : > { %p182_p1 = scmp.eq.s32.totalorder %s181_s9, 0  ;;  %p195_p2 = scmp.eq.s32.totalorder %s2212_s28, 1 }
   0x7   : > { %p200_p3 = scmp.ne.s32.totalorder %s2135_s25, %s2131_s24  ;;  %p201_p4 = scmp.eq.s32.totalorder %s1753_s29, 1 }
   0x8   : > { %s2227_s10 = scalar_select %p182_p1, %s2139_s26, %s184_s8  }
   0x9   : > { %p2229_p5 = por %p195_p2, %p194_p0  ;;  %p2233_p6 = por %p201_p4, %p200_p3 }
   0xa   : > { %p1756_p7 = scmp.ge.s32.totalorder %s2143_s27, 1  ;;  %p250_p8 = scmp.lt.s32.totalorder %s2143_s27, 3 }
   0xc   : > { %p251_p9 = pnand %p1756_p7, %p250_p8 }
   0xe   : > { %254 = sbr.rel (%p251_p9) target bundleno = 1468 (0x5bc), region = 48 }
  0x15   : > { %v2057_v0 = vld [vmem:[%s2932_s2] sm:$0xff]   ;;  %vm407_vm0 = vcmask 1043456   ;;  %v2058_v1 = vld [vmem:[%s2932_s2 + $0x8] ss:$0 sps:$4 sm:$0xff]   ;;  %p287_p10 = scmp.lt.s32.totalorder %s2212_s28, 1  ;;  %vm382_vm1 = vcmask 195584  }
  0x16   : > { %1884 = vmatprep.subr.bf16.mxu0 %v2057_v0  ;;  %v409_v2 = vsel %vm407_vm0, %v2058_v1, 0  ;;  %v2075_v12 = vld [vmem:[%s2933_s3] sm:$0xff]   ;;  %v2076_v13 = vld [vmem:[%s2933_s3 + $0x8] sm:$0xff]   ;;  %v2077_v14 = vld [vmem:[%s2933_s3 + $0x10] sm:$0xff]   ;;  %vm724_vm2 = vcmask 523264   ;;  %s2146_s22 = smov 32  }
  0x17   : > { %1885 = vmatpush3.bf16.msra.mxu0 %v2057_v0  ;;  %s288_s17 = scalar_select %p287_p10, %s2212_s28, 1  ;;  %v2078_v15 = vld [vmem:[%s2933_s3 + $0x18] sm:$0xff]   ;;  %vm1126_vm3 = vcmask 261120   ;;  %vm1632_vm4 = vcmask 785408  }
  0x18   : > { %2012 = vmatprep.subr.msk.bf16.mxu0 %vm407_vm0, %v2058_v1  ;;  %s2147_s23 = smov 96   ;;  %s284_s16 = sand.u32 1, %s2135_s25  }
  0x19   : > { %s1817_s18 = sshll.u32 %s288_s17, 6  ;;  %s1757_s17 = sshll.u32 %s284_s16, 7 }
  0x1a   : > { %s296_s21 = scalar_lea.vmem %s2931_s1, %s1817_s18  ;;  %s2261_s29 = scalar_lea.vmem %s2930_s0, %s1817_s18 }
  0x1b   : > { %1887 = vmatpush3.bf16.msra.mxu0 %v409_v2  ;;  %v2059_v3 = vld [vmem:[%s296_s21] sm:$0xff]   ;;  %v2060_v4 = vld [vmem:[%s296_s21 + $0x8] sm:$0xff]   ;;  %v2061_v5 = vld [vmem:[%s296_s21 + $0x10] sm:$0xff]   ;;  %s2784_s18 = scalar_lea.vmem [#allocation2], %s1757_s17  ;;  %s1819_s19 = sshll.u32 %s2212_s28, 11 }
  0x1c   : > { %1888 = vmatprep.mubr.msk.bf16.mxu0 %vm382_vm1, %v2059_v3  ;;  %v2062_v6 = vld [vmem:[%s296_s21 + $0x18] sm:$0xff]   ;;  %v2063_v7 = vld [vmem:[%s296_s21 + $0x20] sm:$0xff]   ;;  %v2064_v8 = vld [vmem:[%s296_s21 + $0x28] sm:$0xff]   ;;  %1936 = vmatprep.subr.bf16.mxu0 %v2075_v12  ;;  %s1679_s20 = sshll.u32 %s2784_s18, 4  ;;  %s2148_s8 = smov [#allocation2]   ;;  %s2881_s20 = int_to_ptr.vmem [resolvable:$true] %s1679_s20 }
  0x1d   : > { %v2065_v9 = vld [vmem:[%s296_s21 + $0x30] sm:$0xff]   ;;  %v2066_v10 = vld [vmem:[%s296_s21 + $0x38] sm:$0xff]   ;;  %v2264_v11 = vld [vmem:[%s2261_s29] sm:$0xff]   ;;  %s2145_s21 = smov 64   ;;  %s2085_s9 = sshll.u32 %s2148_s8, 4  ;;  %s2086_s9 = int_to_ptr.vmem [resolvable:$false] %s2085_s9 }
  0x1e   : > { %1889 = vmatmul.mubr.msk.bf16.vlgmr.msra.gmra.mrb[0].mxu0 %vm382_vm1, %v2060_v4  ;;  %1920 = vmatprep.mubr.bf16.mxu1 %v2264_v11  ;;  %v2328_v56 = vld [vmem:[%s2261_s29 + $0x8] sm:$0xff]   ;;  %v2331_v57 = vld [vmem:[%s2261_s29 + $0x10] sm:$0xff]   ;;  %v2336_v58 = vld [vmem:[%s2261_s29 + $0x18] sm:$0xff]   ;;  %s2087_s13 = scalar_lea.vmem %s2086_s9, 4096  ;;  %p2088_p0 = scmp.lt.s32.totalorder %s2881_s20, %s2086_s9 }
  0x1f   : > { %1892 = vmatprep.mubr.msk.bf16.mxu0 %vm382_vm1, %v2061_v5  ;;  %1937 = vmatpush3.bf16.msra.mxu0 %v2075_v12  ;;  %v2339_v59 = vld [vmem:[%s2261_s29 + $0x20] sm:$0xff]   ;;  %v2344_v60 = vld [vmem:[%s2261_s29 + $0x28] sm:$0xff]   ;;  %v2347_v61 = vld [vmem:[%s2261_s29 + $0x30] sm:$0xff]  }
  0x20   : > { %1938 = vmatprep.subr.bf16.mxu0 %v2076_v13  ;;  %v2352_v62 = vld [vmem:[%s2261_s29 + $0x38] sm:$0xff]   ;;  %s2081_s29 = scalar_lea.vmem %s2881_s20, 2048 }
  0x21   : > { %p2082_p11 = scmp.ne.s32.totalorder %s2881_s20, %s2081_s29  ;;  %p2089_p1 = scmp.lt.s32.totalorder %s2087_s13, %s2081_s29 }
  0x23   : > { %1939 = vmatpush3.bf16.msra.mxu0 %v2076_v13  ;;  %p2083_p12 = pnand %p2082_p11, %p2229_p5  ;;  %p2090_p2 = por %p2089_p1, %p2088_p0 }
  0x24   : > { %1940 = vmatprep.subr.bf16.mxu0 %v2077_v14 }
  0x25   : > { %p2084_p13 = pneg %p2083_p12 }
  0x26   : > { %1893 = vmatmul.mubr.msk.bf16.gmra.mrb[4].mxu0 %vm382_vm1, %v2062_v6 }
  0x27   : > { %1896 = vmatprep.mubr.msk.bf16.mxu0 %vm382_vm1, %v2063_v7  ;;  %1941 = vmatpush3.bf16.msra.mxu0 %v2077_v14  ;;  %p2091_p3 = pnand %p2090_p2, %p2084_p13 }
  0x28   : > { %1942 = vmatprep.subr.bf16.mxu0 %v2078_v15 }
  0x2b   : > { %1943 = vmatpush3.bf16.msra.mxu0 %v2078_v15 }
  0x2e   : > { %1897 = vmatmul.mubr.msk.bf16.gmra.mrb[8].mxu0 %vm382_vm1, %v2064_v8 }
  0x2f   : > { %1900 = vmatprep.mubr.msk.bf16.mxu0 %vm382_vm1, %v2065_v9 }
  0x36   : > { %1901 = vmatmul.mubr.msk.bf16.gmra.mrb[12].mxu0 %vm382_vm1, %v2066_v10 }
  0xf1   : > { %v1890_v16 = vpop.f32.mrb[0].mxu0 }
  0xf2   : > { %v445_v17 = vpop.f32.mrb[1].mxu0  ;;  %v2285_v23 = vmax.f32 %v1890_v16, 0.0 }
  0xf3   : > { %v1891_v18 = vpop.f32.mrb[2].mxu0  ;;  %v2279_v20 = vmax.f32 %v445_v17, 0.0 }
  0xf4   : > { %v448_v19 = vpop.f32.mrb[3].mxu0  ;;  %v2281_v21 = vmax.f32 %v1891_v18, 0.0 }
  0xf5   : > { %v2283_v22 = vmax.f32 %v448_v19, 0.0 }
  0xf6   : > { %v525_v26 = vpack.c.bf16 %v2281_v21, %v2285_v23 }
  0xf7   : > { %v524_v24 = vpack.c.bf16 %v2283_v22, %v2279_v20 }
  0xf9   : > { %v1894_v25 = vpop.f32.mrb[4].mxu0  ;;  %1904 = vmatprep.subr.bf16.mxu1 %v524_v24 }
  0xfa   : > { %v461_v27 = vpop.f32.mrb[5].mxu0  ;;  %1905 = vmatpush3.bf16.msra.mxu1 %v524_v24  ;;  %v2297_v33 = vmax.f32 %v1894_v25, 0.0 }
  0xfb   : > { %v1895_v28 = vpop.f32.mrb[6].mxu0  ;;  %1906 = vmatprep.subr.bf16.mxu1 %v525_v26  ;;  %v2291_v30 = vmax.f32 %v461_v27, 0.0  ;;  %v1788_v27 = vld [vmem:[%s2934_s4] ss:$0 sm:$0xff] }
  0xfc   : > { %v464_v29 = vpop.f32.mrb[7].mxu0  ;;  %v2293_v31 = vmax.f32 %v1895_v28, 0.0 }
  0xfd   : > { %v2295_v32 = vmax.f32 %v464_v29, 0.0 }
  0xfe   : > { %1907 = vmatpush3.bf16.msra.mxu1 %v525_v26  ;;  %v527_v36 = vpack.c.bf16 %v2293_v31, %v2297_v33 }
  0xff   : > { %v526_v34 = vpack.c.bf16 %v2295_v32, %v2291_v30 }
 0x101   : > { %v1898_v35 = vpop.f32.mrb[8].mxu0  ;;  %1908 = vmatprep.subr.bf16.mxu1 %v526_v34 }
 0x102   : > { %v477_v37 = vpop.f32.mrb[9].mxu0  ;;  %1909 = vmatpush3.bf16.msra.mxu1 %v526_v34  ;;  %v2309_v43 = vmax.f32 %v1898_v35, 0.0 }
 0x103   : > { %v1899_v38 = vpop.f32.mrb[10].mxu0  ;;  %1910 = vmatprep.subr.bf16.mxu1 %v527_v36  ;;  %v2303_v40 = vmax.f32 %v477_v37, 0.0 }
 0x104   : > { %v480_v39 = vpop.f32.mrb[11].mxu0  ;;  %v2305_v41 = vmax.f32 %v1899_v38, 0.0 }
 0x105   : > { %v2307_v42 = vmax.f32 %v480_v39, 0.0 }
 0x106   : > { %1911 = vmatpush3.bf16.msra.mxu1 %v527_v36  ;;  %v529_v46 = vpack.c.bf16 %v2305_v41, %v2309_v43 }
 0x107   : > { %v528_v44 = vpack.c.bf16 %v2307_v42, %v2303_v40 }
 0x109   : > { %v1902_v45 = vpop.f32.mrb[12].mxu0  ;;  %1912 = vmatprep.subr.bf16.mxu1 %v528_v44 }
 0x10a   : > { %v493_v47 = vpop.f32.mrb[13].mxu0  ;;  %1913 = vmatpush3.bf16.msra.mxu1 %v528_v44  ;;  %v2321_v53 = vmax.f32 %v1902_v45, 0.0 }
 0x10b   : > { %v1903_v48 = vpop.f32.mrb[14].mxu0  ;;  %1914 = vmatprep.subr.bf16.mxu1 %v529_v46  ;;  %v2315_v50 = vmax.f32 %v493_v47, 0.0 }
 0x10c   : > { %v496_v49 = vpop.f32.mrb[15].mxu0  ;;  %v2317_v51 = vmax.f32 %v1903_v48, 0.0 }
 0x10d   : > { %v2319_v52 = vmax.f32 %v496_v49, 0.0 }
 0x10e   : > { %1915 = vmatpush3.bf16.msra.mxu1 %v529_v46  ;;  %v531_v55 = vpack.c.bf16 %v2317_v51, %v2321_v53 }
 0x10f   : > { %v530_v54 = vpack.c.bf16 %v2319_v52, %v2315_v50 }
 0x111   : > { %1916 = vmatprep.subr.bf16.mxu1 %v530_v54 }
 0x112   : > { %1917 = vmatpush3.bf16.msra.mxu1 %v530_v54 }
 0x113   : > { %1918 = vmatprep.subr.bf16.mxu1 %v531_v55 }
 0x116   : > { %1919 = vmatpush3.bf16.msra.mxu1 %v531_v55 }
 0x119   : > { %1921 = vmatmul.mubr.bf16.vlgmr.msra.gmra.mrb[0].mxu1 %v2328_v56 }
 0x11a   : > { %1924 = vmatprep.mubr.bf16.mxu1 %v2331_v57 }
 0x121   : > { %1925 = vmatmul.mubr.bf16.gmra.mrb[4].mxu1 %v2336_v58 }
 0x122   : > { %1928 = vmatprep.mubr.bf16.mxu1 %v2339_v59 }
 0x129   : > { %1929 = vmatmul.mubr.bf16.gmra.mrb[8].mxu1 %v2344_v60 }
 0x12a   : > { %1932 = vmatprep.mubr.bf16.mxu1 %v2347_v61 }
 0x131   : > { %1933 = vmatmul.mubr.bf16.gmra.mrb[12].mxu1 %v2352_v62 }
 0x132   : > { %1976 = vmatprep.mubr.bf16.mxu1 %v2264_v11 }
 0x1ec   : > { %v1922_v63 = vpop.f32.mrb[0].mxu1 }
 0x1ed   : > { %v614_v0 = vpop.f32.mrb[1].mxu1 }
 0x1ee   : > { %v1923_v1 = vpop.f32.mrb[2].mxu1 }
 0x1ef   : > { %v678_v2 = vpack.c.bf16 %v1923_v1, %v1922_v63  ;;  %v617_v3 = vpop.f32.mrb[3].mxu1 }
 0x1f0   : > { %v677_v4 = vpack.c.bf16 %v617_v3, %v614_v0 }
 0x1f2   : > { %1944 = vmatprep.mubr.msk.bf16.mxu0 %vm724_vm2, %v677_v4 }
 0x1f3   : > { %1945 = vmatmul.mubr.msk.bf16.vlgmr.msra.gmra.mrb[16].mxu0 %vm724_vm2, %v678_v2 }
 0x1f4   : > { %v1926_v5 = vpop.f32.mrb[4].mxu1 }
 0x1f5   : > { %v630_v6 = vpop.f32.mrb[5].mxu1 }
 0x1f6   : > { %v1927_v7 = vpop.f32.mrb[6].mxu1 }
 0x1f7   : > { %v680_v8 = vpack.c.bf16 %v1927_v7, %v1926_v5  ;;  %v633_v9 = vpop.f32.mrb[7].mxu1 }
 0x1f8   : > { %v679_v10 = vpack.c.bf16 %v633_v9, %v630_v6 }
 0x1fa   : > { %1948 = vmatprep.mubr.msk.bf16.mxu0 %vm724_vm2, %v679_v10 }
 0x1fb   : > { %1949 = vmatmul.mubr.msk.bf16.gmra.mrb[20].mxu0 %vm724_vm2, %v680_v8 }
 0x1fc   : > { %v1930_v11 = vpop.f32.mrb[8].mxu1 }
 0x1fd   : > { %v646_v12 = vpop.f32.mrb[9].mxu1 }
 0x1fe   : > { %v1931_v13 = vpop.f32.mrb[10].mxu1 }
 0x1ff   : > { %v682_v14 = vpack.c.bf16 %v1931_v13, %v1930_v11  ;;  %v649_v15 = vpop.f32.mrb[11].mxu1 }
 0x200   : > { %v681_v16 = vpack.c.bf16 %v649_v15, %v646_v12 }
 0x202   : > { %1952 = vmatprep.mubr.msk.bf16.mxu0 %vm724_vm2, %v681_v16 }
 0x203   : > { %1953 = vmatmul.mubr.msk.bf16.gmra.mrb[24].mxu0 %vm724_vm2, %v682_v14 }
 0x204   : > { %v1934_v17 = vpop.f32.mrb[12].mxu1 }
 0x205   : > { %v662_v18 = vpop.f32.mrb[13].mxu1 }
 0x206   : > { %v1935_v19 = vpop.f32.mrb[14].mxu1 }
 0x207   : > { %v684_v24 = vpack.c.bf16 %v1935_v19, %v1934_v17  ;;  %v665_v25 = vpop.f32.mrb[15].mxu1 }
 0x208   : > { %v683_v26 = vpack.c.bf16 %v665_v25, %v662_v18 }
 0x20a   : > { %1956 = vmatprep.mubr.msk.bf16.mxu0 %vm724_vm2, %v683_v26 }
 0x20b   : > { %1957 = vmatmul.mubr.msk.bf16.gmra.mrb[28].mxu0 %vm724_vm2, %v684_v24 }
 0x2c6   : > { %v1946_v28 = vpop.f32.mrb[16].mxu0 }
 0x2c7   : > { %v2367_v29 = vadd.f32 %v1946_v28, %v1788_v27  ;;  %v783_v34 = vpop.f32.mrb[17].mxu0 }
 0x2c8   : > { %v2369_v35 = vadd.f32 %v1788_v27, %v783_v34  ;;  %v1947_v36 = vpop.f32.mrb[18].mxu0 }
 0x2c9   : > { %866 = vrot.lane.b32.xlu1 %v2367_v29, %s2145_s21  ;;  %v786_v37 = vpop.f32.mrb[19].mxu0  ;;  %v2375_v38 = vadd.f32 %v1947_v36, %v1788_v27 }
 0x2ca   : > { %862 = vrot.lane.b32.xlu0 %v2369_v35, %s2145_s21  ;;  %v2377_v39 = vadd.f32 %v1788_v27, %v786_v37 }
 0x2cd   : > { %868 = vrot.lane.b32.xlu1 %v2375_v38, %s2145_s21 }
 0x2ce   : > { %864 = vrot.lane.b32.xlu0 %v2377_v39, %s2145_s21  ;;  %v1950_v44 = vpop.f32.mrb[20].mxu0 }
 0x2cf   : > { %v799_v45 = vpop.f32.mrb[21].mxu0  ;;  %v2389_v54 = vadd.f32 %v1950_v44, %v1788_v27 }
 0x2d0   : > { %v2383_v46 = vadd.f32 %v1788_v27, %v799_v45  ;;  %v1951_v47 = vpop.f32.mrb[22].mxu0 }
 0x2d1   : > { %v802_v48 = vpop.f32.mrb[23].mxu0  ;;  %v2393_v55 = vadd.f32 %v1951_v47, %v1788_v27 }
 0x2d2   : > { %v2385_v49 = vadd.f32 %v1788_v27, %v802_v48  ;;  %870 = vrot.lane.b32.xlu0 %v2383_v46, %s2145_s21 }
 0x2d4   : > { %872 = vrot.lane.b32.xlu1 %v2385_v49, %s2145_s21 }
 0x2d6   : > { %874 = vrot.lane.b32.xlu0 %v2389_v54, %s2145_s21  ;;  %v1954_v63 = vpop.f32.mrb[24].mxu0 }
 0x2d7   : > { %v815_v0 = vpop.f32.mrb[25].mxu0  ;;  %v2405_v5 = vadd.f32 %v1954_v63, %v1788_v27 }
 0x2d8   : > { %v2397_v1 = vadd.f32 %v1788_v27, %v815_v0  ;;  %876 = vrot.lane.b32.xlu1 %v2393_v55, %s2145_s21  ;;  %v1955_v2 = vpop.f32.mrb[26].mxu0 }
 0x2d9   : > { %v818_v3 = vpop.f32.mrb[27].mxu0  ;;  %v2409_v6 = vadd.f32 %v1955_v2, %v1788_v27 }
 0x2da   : > { %v2401_v4 = vadd.f32 %v1788_v27, %v818_v3  ;;  %878 = vrot.lane.b32.xlu0 %v2397_v1, %s2145_s21 }
 0x2dc   : > { %880 = vrot.lane.b32.xlu1 %v2401_v4, %s2145_s21 }
 0x2de   : > { %882 = vrot.lane.b32.xlu0 %v2405_v5, %s2145_s21  ;;  %v1958_v7 = vpop.f32.mrb[28].mxu0 }
 0x2df   : > { %v831_v8 = vpop.f32.mrb[29].mxu0  ;;  %v2421_v13 = vadd.f32 %v1958_v7, %v1788_v27 }
 0x2e0   : > { %v2413_v9 = vadd.f32 %v1788_v27, %v831_v8  ;;  %884 = vrot.lane.b32.xlu1 %v2409_v6, %s2145_s21  ;;  %v1959_v10 = vpop.f32.mrb[30].mxu0 }
 0x2e1   : > { %v834_v11 = vpop.f32.mrb[31].mxu0  ;;  %v2425_v14 = vadd.f32 %v1959_v10, %v1788_v27 }
 0x2e2   : > { %v2417_v12 = vadd.f32 %v1788_v27, %v834_v11  ;;  %886 = vrot.lane.b32.xlu0 %v2413_v9, %s2145_s21 }
 0x2e4   : > { %888 = vrot.lane.b32.xlu1 %v2417_v12, %s2145_s21 }
 0x2e6   : > { %890 = vrot.lane.b32.xlu0 %v2421_v13, %s2145_s21 }
 0x2e8   : > { %892 = vrot.lane.b32.xlu1 %v2425_v14, %s2145_s21 }
 0x2ea   : > { %926 = vrot.lane.b32.xlu0 %v2369_v35, %s2146_s22 }
 0x2ec   : > { %928 = vrot.lane.b32.xlu1 %v2377_v39, %s2146_s22 }
 0x2ee   : > { %930 = vrot.lane.b32.xlu0 %v2367_v29, %s2146_s22 }
 0x2f0   : > { %932 = vrot.lane.b32.xlu1 %v2375_v38, %s2146_s22 }
 0x2f2   : > { %934 = vrot.lane.b32.xlu0 %v2383_v46, %s2146_s22 }
 0x2f4   : > { %936 = vrot.lane.b32.xlu1 %v2385_v49, %s2146_s22 }
 0x2f6   : > { %938 = vrot.lane.b32.xlu0 %v2389_v54, %s2146_s22 }
 0x2f8   : > { %940 = vrot.lane.b32.xlu1 %v2393_v55, %s2146_s22 }
 0x2fa   : > { %942 = vrot.lane.b32.xlu0 %v2397_v1, %s2146_s22 }
 0x2fc   : > { %944 = vrot.lane.b32.xlu1 %v2401_v4, %s2146_s22 }
 0x2fe   : > { %946 = vrot.lane.b32.xlu0 %v2405_v5, %s2146_s22 }
 0x300   : > { %948 = vrot.lane.b32.xlu1 %v2409_v6, %s2146_s22 }
 0x302   : > { %950 = vrot.lane.b32.xlu0 %v2413_v9, %s2146_s22 }
 0x304   : > { %956 = vrot.lane.b32.xlu1 %v2425_v14, %s2146_s22 }
 0x306   : > { %954 = vrot.lane.b32.xlu0 %v2421_v13, %s2146_s22 }
 0x308   : > { %1266 = vrot.lane.b32.xlu1 %v2283_v22, %s2147_s23 }
 0x30a   : > { %1264 = vrot.lane.b32.xlu0 %v2279_v20, %s2147_s23 }
 0x30c   : > { %1270 = vrot.lane.b32.xlu1 %v2281_v21, %s2147_s23 }
 0x30e   : > { %1268 = vrot.lane.b32.xlu0 %v2285_v23, %s2147_s23 }
 0x310   : > { %1274 = vrot.lane.b32.xlu1 %v2295_v32, %s2147_s23 }
 0x312   : > { %1272 = vrot.lane.b32.xlu0 %v2291_v30, %s2147_s23 }
 0x314   : > { %1278 = vrot.lane.b32.xlu1 %v2293_v31, %s2147_s23 }
 0x316   : > { %1276 = vrot.lane.b32.xlu0 %v2297_v33, %s2147_s23 }
 0x318   : > { %1282 = vrot.lane.b32.xlu1 %v2307_v42, %s2147_s23 }
 0x31a   : > { %1280 = vrot.lane.b32.xlu0 %v2303_v40, %s2147_s23 }
 0x31c   : > { %1286 = vrot.lane.b32.xlu1 %v2305_v41, %s2147_s23 }
 0x31e   : > { %1284 = vrot.lane.b32.xlu0 %v2309_v43, %s2147_s23 }
 0x320   : > { %1290 = vrot.lane.b32.xlu1 %v2319_v52, %s2147_s23 }
 0x322   : > { %1288 = vrot.lane.b32.xlu0 %v2315_v50, %s2147_s23 }
 0x324   : > { %1294 = vrot.lane.b32.xlu1 %v2317_v51, %s2147_s23 }
 0x326   : > { %1292 = vrot.lane.b32.xlu0 %v2321_v53, %s2147_s23  ;;  %s2889_s23 = scalar_lea.sflag [#allocation3], %s284_s16 }
 0x328   : > { %952 = vrot.lane.b32.xlu1 %v2417_v12, %s2146_s22 }
 0x33b   : > { %v867_v15 = vpop.permute.xlu1 %866 }
 0x33c   : > { %v2480_v16 = vadd.f32 %v867_v15, %v2367_v29  ;;  %v863_v17 = vpop.permute.xlu0 %862 }
 0x33d   : > { %v2488_v25 = vadd.f32 %v863_v17, %v2369_v35 }
 0x33e   : > { %1348 = vrot.lane.b32.xlu0 %v2480_v16, %s2146_s22 }
 0x33f   : > { %v869_v18 = vpop.permute.xlu1 %868 }
 0x340   : > { %v2485_v19 = vadd.f32 %v869_v18, %v2375_v38  ;;  %v865_v24 = vpop.permute.xlu0 %864 }
 0x341   : > { %v2491_v26 = vadd.f32 %v865_v24, %v2377_v39 }
 0x342   : > { %2941 = vst [vmem:[#allocation5_spill] sm:$0xff] %v2485_v19  ;;  %1350 = vrot.lane.b32.xlu1 %v2485_v19, %s2146_s22  ;;  %v991_v34 = vpack.c.bf16 %v2485_v19, %v2480_v16 }
 0x343   : > { %v990_v27 = vpack.c.bf16 %v2491_v26, %v2488_v25 }
 0x344   : > { %v871_v28 = vpop.permute.xlu0 %870 }
 0x345   : > { %1960 = vmatprep.subr.bf16.mxu1 %v990_v27  ;;  %v2500_v37 = vadd.f32 %v871_v28, %v2383_v46 }
 0x346   : > { %1961 = vmatpush3.bf16.msra.mxu1 %v990_v27  ;;  %v873_v36 = vpop.permute.xlu1 %872 }
 0x347   : > { %v2503_v44 = vadd.f32 %v873_v36, %v2385_v49  ;;  %1962 = vmatprep.subr.bf16.mxu1 %v991_v34 }
 0x348   : > { %v875_v45 = vpop.permute.xlu0 %874 }
 0x349   : > { %v992_v47 = vpack.c.bf16 %v2503_v44, %v2500_v37  ;;  %v2508_v63 = vadd.f32 %v875_v45, %v2389_v54 }
 0x34a   : > { %1963 = vmatpush3.bf16.msra.mxu1 %v991_v34  ;;  %v877_v48 = vpop.permute.xlu1 %876 }
 0x34b   : > { %v2511_v0 = vadd.f32 %v877_v48, %v2393_v55  ;;  %1964 = vmatprep.subr.bf16.mxu1 %v992_v47 }
 0x34c   : > { %v879_v2 = vpop.permute.xlu0 %878 }
 0x34d   : > { %v993_v3 = vpack.c.bf16 %v2511_v0, %v2508_v63  ;;  %v2516_v8 = vadd.f32 %v879_v2, %v2397_v1 }
 0x34e   : > { %1965 = vmatpush3.bf16.msra.mxu1 %v992_v47  ;;  %v881_v7 = vpop.permute.xlu1 %880 }
 0x34f   : > { %v2519_v10 = vadd.f32 %v881_v7, %v2401_v4  ;;  %1966 = vmatprep.subr.bf16.mxu1 %v993_v3 }
 0x350   : > { %v883_v11 = vpop.permute.xlu0 %882 }
 0x351   : > { %v994_v15 = vpack.c.bf16 %v2519_v10, %v2516_v8  ;;  %v2524_v18 = vadd.f32 %v883_v11, %v2405_v5 }
 0x352   : > { %1967 = vmatpush3.bf16.msra.mxu1 %v993_v3  ;;  %v885_v17 = vpop.permute.xlu1 %884 }
 0x353   : > { %v2527_v24 = vadd.f32 %v885_v17, %v2409_v6  ;;  %1968 = vmatprep.subr.bf16.mxu1 %v994_v15 }
 0x354   : > { %v887_v27 = vpop.permute.xlu0 %886 }
 0x355   : > { %v995_v28 = vpack.c.bf16 %v2527_v24, %v2524_v18  ;;  %v2532_v36 = vadd.f32 %v887_v27, %v2413_v9 }
 0x356   : > { %1969 = vmatpush3.bf16.msra.mxu1 %v994_v15  ;;  %v889_v34 = vpop.permute.xlu1 %888 }
 0x357   : > { %v2535_v45 = vadd.f32 %v889_v34, %v2417_v12  ;;  %1970 = vmatprep.subr.bf16.mxu1 %v995_v28 }
 0x358   : > { %v891_v47 = vpop.permute.xlu0 %890 }
 0x359   : > { %v996_v48 = vpack.c.bf16 %v2535_v45, %v2532_v36  ;;  %v2540_v3 = vadd.f32 %v891_v47, %v2421_v13 }
 0x35a   : > { %1971 = vmatpush3.bf16.msra.mxu1 %v995_v28  ;;  %v893_v2 = vpop.permute.xlu1 %892 }
 0x35b   : > { %v2543_v7 = vadd.f32 %v893_v2, %v2425_v14  ;;  %1972 = vmatprep.subr.bf16.mxu1 %v996_v48 }
 0x35c   : > { %v927_v11 = vpop.permute.xlu0 %926 }
 0x35d   : > { %v997_v15 = vpack.c.bf16 %v2543_v7, %v2540_v3 }
 0x35e   : > { %v929_v17 = vpop.permute.xlu1 %928  ;;  %1973 = vmatpush3.bf16.msra.mxu1 %v996_v48 }
 0x35f   : > { %1974 = vmatprep.subr.bf16.mxu1 %v997_v15 }
 0x360   : > { %v931_v27 = vpop.permute.xlu0 %930 }
 0x361   : > { %v976_v34 = vadd.f32 %v931_v27, %v2285_v23  ;;  %v974_v23 = vadd.f32 %v927_v11, %v2279_v20 }
 0x362   : > { %v933_v19 = vpop.permute.xlu1 %932  ;;  %1975 = vmatpush3.bf16.msra.mxu1 %v997_v15 }
 0x363   : > { %v977_v28 = vadd.f32 %v933_v19, %v2281_v21  ;;  %1428 = vrot.lane.b32.xlu0 %v976_v34, %s2146_s22  ;;  %v975_v19 = vadd.f32 %v929_v17, %v2283_v22 }
 0x364   : > { %v935_v47 = vpop.permute.xlu0 %934 }
 0x365   : > { %1430 = vrot.lane.b32.xlu1 %v977_v28, %s2146_s22  ;;  %1977 = vmatmul.mubr.bf16.vlgmr.msra.gmra.mrb[16].mxu1 %v2328_v56 }
 0x366   : > { %v937_v2 = vpop.permute.xlu1 %936  ;;  %1980 = vmatprep.mubr.bf16.mxu1 %v2331_v57 }
 0x367   : > { %1344 = vrot.lane.b32.xlu0 %v2488_v25, %s2146_s22 }
 0x368   : > { %v939_v48 = vpop.permute.xlu0 %938 }
 0x369   : > { %1346 = vrot.lane.b32.xlu1 %v2491_v26, %s2146_s22  ;;  %v980_v57 = vadd.f32 %v939_v48, %v2297_v33  ;;  %v978_v33 = vadd.f32 %v935_v47, %v2291_v30 }
 0x36a   : > { %v941_v21 = vpop.permute.xlu1 %940 }
 0x36b   : > { %1424 = vrot.lane.b32.xlu0 %v974_v23, %s2146_s22  ;;  %v981_v11 = vadd.f32 %v941_v21, %v2293_v31  ;;  %v979_v31 = vadd.f32 %v937_v2, %v2295_v32 }
 0x36c   : > { %v943_v15 = vpop.permute.xlu0 %942 }
 0x36d   : > { %1426 = vrot.lane.b32.xlu1 %v975_v19, %s2146_s22  ;;  %1981 = vmatmul.mubr.bf16.gmra.mrb[20].mxu1 %v2336_v58 }
 0x36e   : > { %v945_v56 = vpop.permute.xlu1 %944  ;;  %1984 = vmatprep.mubr.bf16.mxu1 %v2339_v59 }
 0x36f   : > { %1356 = vrot.lane.b32.xlu0 %v2508_v63, %s2146_s22 }
 0x370   : > { %v947_v20 = vpop.permute.xlu0 %946 }
 0x371   : > { %1358 = vrot.lane.b32.xlu1 %v2511_v0, %s2146_s22  ;;  %v984_v30 = vadd.f32 %v947_v20, %v2309_v43  ;;  %v982_v43 = vadd.f32 %v943_v15, %v2303_v40  ;;  %v2079_v40 = vld [vmem:[%s2935_s5] sm:$0xff]  }
 0x372   : > { %v949_v22 = vpop.permute.xlu1 %948  ;;  %1992 = vmatprep.subr.bf16.mxu0 %v2079_v40 }
 0x373   : > { %1436 = vrot.lane.b32.xlu0 %v980_v57, %s2146_s22  ;;  %v985_v34 = vadd.f32 %v949_v22, %v2305_v41  ;;  %v983_v41 = vadd.f32 %v945_v56, %v2307_v42  ;;  %1993 = vmatpush3.bf16.msra.mxu0 %v2079_v40 }
 0x374   : > { %v951_v58 = vpop.permute.xlu0 %950 }
 0x375   : > { %1438 = vrot.lane.b32.xlu1 %v981_v11, %s2146_s22  ;;  %1985 = vmatmul.mubr.bf16.gmra.mrb[24].mxu1 %v2344_v60 }
 0x376   : > { %v957_v59 = vpop.permute.xlu1 %956  ;;  %1988 = vmatprep.mubr.bf16.mxu1 %v2347_v61 }
 0x377   : > { %1352 = vrot.lane.b32.xlu0 %v2500_v37, %s2146_s22  ;;  %v989_v21 = vadd.f32 %v957_v59, %v2317_v51 }
 0x378   : > { %v955_v27 = vpop.permute.xlu0 %954 }
 0x379   : > { %1354 = vrot.lane.b32.xlu1 %v2503_v44, %s2146_s22  ;;  %v988_v23 = vadd.f32 %v955_v27, %v2321_v53  ;;  %v986_v53 = vadd.f32 %v951_v58, %v2315_v50  ;;  %v2080_v50 = vld [vmem:[%s2935_s5 + $0x8] sm:$0xff]  }
 0x37a   : > { %v2578_v17 = vpop.permute.xlu1 %1266  ;;  %1994 = vmatprep.subr.bf16.mxu0 %v2080_v50 }
 0x37b   : > { %1432 = vrot.lane.b32.xlu0 %v978_v33, %s2146_s22  ;;  %1995 = vmatpush3.bf16.msra.mxu0 %v2080_v50 }
 0x37c   : > { %v2591_v61 = vpop.permute.xlu0 %1264 }
 0x37d   : > { %1434 = vrot.lane.b32.xlu1 %v979_v31, %s2146_s22  ;;  %1989 = vmatmul.mubr.bf16.gmra.mrb[28].mxu1 %v2352_v62 }
 0x37e   : > { %v2584_v60 = vpop.permute.xlu1 %1270 }
 0x37f   : > { %1364 = vrot.lane.b32.xlu0 %v2524_v18, %s2146_s22 }
 0x380   : > { %v2602_v28 = vpop.permute.xlu0 %1268 }
 0x381   : > { %1366 = vrot.lane.b32.xlu1 %v2527_v24, %s2146_s22 }
 0x382   : > { %v2593_v32 = vpop.permute.xlu1 %1274 }
 0x383   : > { %1444 = vrot.lane.b32.xlu0 %v984_v30, %s2146_s22 }
 0x384   : > { %v2612_v2 = vpop.permute.xlu0 %1272 }
 0x385   : > { %1446 = vrot.lane.b32.xlu1 %v985_v34, %s2146_s22 }
 0x386   : > { %v2598_v62 = vpop.permute.xlu1 %1278 }
 0x387   : > { %1360 = vrot.lane.b32.xlu0 %v2516_v8, %s2146_s22 }
 0x388   : > { %v2628_v19 = vpop.permute.xlu0 %1276 }
 0x389   : > { %1362 = vrot.lane.b32.xlu1 %v2519_v10, %s2146_s22 }
 0x38a   : > { %v2607_v47 = vpop.permute.xlu1 %1282 }
 0x38b   : > { %1440 = vrot.lane.b32.xlu0 %v982_v43, %s2146_s22 }
 0x38c   : > { %v2638_v56 = vpop.permute.xlu0 %1280 }
 0x38d   : > { %1442 = vrot.lane.b32.xlu1 %v983_v41, %s2146_s22 }
 0x38e   : > { %v2614_v48 = vpop.permute.xlu1 %1286 }
 0x38f   : > { %1372 = vrot.lane.b32.xlu0 %v2540_v3, %s2146_s22 }
 0x390   : > { %v2643_v57 = vpop.permute.xlu0 %1284 }
 0x391   : > { %1374 = vrot.lane.b32.xlu1 %v2543_v7, %s2146_s22 }
 0x392   : > { %v2624_v42 = vpop.permute.xlu1 %1290 }
 0x393   : > { %1452 = vrot.lane.b32.xlu0 %v988_v23, %s2146_s22 }
 0x394   : > { %v2645_v22 = vpop.permute.xlu0 %1288 }
 0x395   : > { %1454 = vrot.lane.b32.xlu1 %v989_v21, %s2146_s22 }
 0x396   : > { %v2631_v15 = vpop.permute.xlu1 %1294 }
 0x397   : > { %1368 = vrot.lane.b32.xlu0 %v2532_v36, %s2146_s22 }
 0x398   : > { %v2650_v11 = vpop.permute.xlu0 %1292 }
 0x399   : > { %1370 = vrot.lane.b32.xlu1 %v2535_v45, %s2146_s22 }
 0x39a   : > { %v953_v51 = vpop.permute.xlu1 %952 }
 0x39b   : > { %v987_v20 = vadd.f32 %v953_v51, %v2319_v52  ;;  %1448 = vrot.lane.b32.xlu0 %v986_v53, %s2146_s22 }
 0x39d   : > { %1450 = vrot.lane.b32.xlu1 %v987_v20, %s2146_s22  ;;  %s2879_s22 = scalar_lea.hbm %s2937_s7, %s1819_s19 }
 0x3b0   : > { %v1349_v58 = vpop.permute.xlu0 %1348 }
 0x3b1   : > { %v1394_v59 = vadd.f32 %v1349_v58, %v2367_v29 }
 0x3b3   : > { %1556 = vrot.lane.b32.xlu0 %v1394_v59, %s2145_s21 }
 0x3b4   : > { %v1351_v52 = vpop.permute.xlu1 %1350 }
 0x3b5   : > { %v1395_v33 = vadd.f32 %v1351_v52, %v2375_v38 }
 0x3b7   : > { %1558 = vrot.lane.b32.xlu1 %v1395_v33, %s2145_s21 }
 0x3d5   : > { %v2656_v31 = vpop.permute.xlu0 %1428 }
 0x3d7   : > { %v2658_v27 = vpop.permute.xlu1 %1430 }
 0x3d9   : > { %v1345_v30 = vpop.permute.xlu0 %1344 }
 0x3da   : > { %v1392_v34 = vadd.f32 %v1345_v30, %v2369_v35 }
 0x3db   : > { %v1347_v43 = vpop.permute.xlu1 %1346 }
 0x3dc   : > { %v1393_v41 = vadd.f32 %v1347_v43, %v2377_v39  ;;  %1552 = vrot.lane.b32.xlu0 %v1392_v34, %s2145_s21 }
 0x3dd   : > { %v2663_v29 = vpop.permute.xlu0 %1424 }
 0x3de   : > { %1554 = vrot.lane.b32.xlu1 %v1393_v41, %s2145_s21 }
 0x3df   : > { %v2666_v40 = vpop.permute.xlu1 %1426 }
 0x3e1   : > { %v1357_v38 = vpop.permute.xlu0 %1356 }
 0x3e2   : > { %v1398_v23 = vadd.f32 %v1357_v38, %v2389_v54 }
 0x3e3   : > { %v1359_v21 = vpop.permute.xlu1 %1358 }
 0x3e4   : > { %v1399_v53 = vadd.f32 %v1359_v21, %v2393_v55  ;;  %1564 = vrot.lane.b32.xlu0 %v1398_v23, %s2145_s21 }
 0x3e5   : > { %v2671_v35 = vpop.permute.xlu0 %1436 }
 0x3e6   : > { %1566 = vrot.lane.b32.xlu1 %v1399_v53, %s2145_s21 }
 0x3e7   : > { %v2674_v39 = vpop.permute.xlu1 %1438 }
 0x3e9   : > { %v1353_v51 = vpop.permute.xlu0 %1352 }
 0x3ea   : > { %v1396_v20 = vadd.f32 %v1353_v51, %v2383_v46 }
 0x3eb   : > { %v1355_v50 = vpop.permute.xlu1 %1354 }
 0x3ec   : > { %v1397_v58 = vadd.f32 %v1355_v50, %v2385_v49  ;;  %1560 = vrot.lane.b32.xlu0 %v1396_v20, %s2145_s21 }
 0x3ed   : > { %v2679_v54 = vpop.permute.xlu0 %1432 }
 0x3ee   : > { %1562 = vrot.lane.b32.xlu1 %v1397_v58, %s2145_s21 }
 0x3ef   : > { %v2682_v55 = vpop.permute.xlu1 %1434 }
 0x3f1   : > { %v1365_v59 = vpop.permute.xlu0 %1364 }
 0x3f2   : > { %v1402_v52 = vadd.f32 %v1365_v59, %v2405_v5 }
 0x3f3   : > { %v1367_v33 = vpop.permute.xlu1 %1366 }
 0x3f4   : > { %v1403_v30 = vadd.f32 %v1367_v33, %v2409_v6  ;;  %1572 = vrot.lane.b32.xlu0 %v1402_v52, %s2145_s21 }
 0x3f5   : > { %v2687_v46 = vpop.permute.xlu0 %1444 }
 0x3f6   : > { %1574 = vrot.lane.b32.xlu1 %v1403_v30, %s2145_s21 }
 0x3f7   : > { %v2690_v49 = vpop.permute.xlu1 %1446 }
 0x3f9   : > { %v1361_v34 = vpop.permute.xlu0 %1360 }
 0x3fa   : > { %v1400_v43 = vadd.f32 %v1361_v34, %v2397_v1 }
 0x3fb   : > { %v1363_v41 = vpop.permute.xlu1 %1362 }
 0x3fc   : > { %v1401_v38 = vadd.f32 %v1363_v41, %v2401_v4  ;;  %1568 = vrot.lane.b32.xlu0 %v1400_v43, %s2145_s21 }
 0x3fd   : > { %v2695_v5 = vpop.permute.xlu0 %1440 }
 0x3fe   : > { %1570 = vrot.lane.b32.xlu1 %v1401_v38, %s2145_s21 }
 0x3ff   : > { %v2698_v6 = vpop.permute.xlu1 %1442 }
 0x401   : > { %v2700_v23 = vpop.permute.xlu0 %1372 }
 0x403   : > { %v2702_v21 = vpop.permute.xlu1 %1374 }
 0x405   : > { %v2704_v53 = vpop.permute.xlu0 %1452 }
 0x407   : > { %v2706_v51 = vpop.permute.xlu1 %1454 }
 0x409   : > { %v1369_v1 = vpop.permute.xlu0 %1368 }
 0x40a   : > { %v1404_v20 = vadd.f32 %v1369_v1, %v2413_v9 }
 0x40b   : > { %v1371_v4 = vpop.permute.xlu1 %1370 }
 0x40c   : > { %v1405_v50 = vadd.f32 %v1371_v4, %v2417_v12  ;;  %1576 = vrot.lane.b32.xlu0 %v1404_v20, %s2145_s21 }
 0x40e   : > { %1578 = vrot.lane.b32.xlu1 %v1405_v50, %s2145_s21 }
 0x438   : > { %v1978_v58 = vpop.f32.mrb[16].mxu1 }
 0x439   : > { %v1032_v59 = vpop.f32.mrb[17].mxu1 }
 0x43a   : > { %v1979_v52 = vpop.f32.mrb[18].mxu1 }
 0x43b   : > { %v1096_v33 = vpack.c.bf16 %v1979_v52, %v1978_v58  ;;  %v1035_v30 = vpop.f32.mrb[19].mxu1 }
 0x43c   : > { %v1095_v34 = vpack.c.bf16 %v1035_v30, %v1032_v59 }
 0x43e   : > { %1996 = vmatprep.mubr.msk.bf16.mxu0 %vm1126_vm3, %v1095_v34 }
 0x43f   : > { %1997 = vmatmul.mubr.msk.bf16.vlgmr.msra.gmra.mrb[32].mxu0 %vm1126_vm3, %v1096_v33 }
 0x440   : > { %v1982_v43 = vpop.f32.mrb[20].mxu1 }
 0x441   : > { %v1048_v9 = vpop.f32.mrb[21].mxu1 }
 0x442   : > { %v1983_v41 = vpop.f32.mrb[22].mxu1 }
 0x443   : > { %v1098_v38 = vpack.c.bf16 %v1983_v41, %v1982_v43  ;;  %v1051_v12 = vpop.f32.mrb[23].mxu1 }
 0x444   : > { %v1097_v1 = vpack.c.bf16 %v1051_v12, %v1048_v9 }
 0x446   : > { %2000 = vmatprep.mubr.msk.bf16.mxu0 %vm1126_vm3, %v1097_v1 }
 0x447   : > { %2001 = vmatmul.mubr.msk.bf16.gmra.mrb[36].mxu0 %vm1126_vm3, %v1098_v38  ;;  %v1801_v38 = vld [vmem:[%s2936_s6] ss:$0 sm:$0xff] }
 0x448   : > { %v1986_v20 = vpop.f32.mrb[24].mxu1 }
 0x449   : > { %v1064_v4 = vpop.f32.mrb[25].mxu1 }
 0x44a   : > { %v1987_v50 = vpop.f32.mrb[26].mxu1 }
 0x44b   : > { %v1100_v58 = vpack.c.bf16 %v1987_v50, %v1986_v20  ;;  %v1067_v59 = vpop.f32.mrb[27].mxu1 }
 0x44c   : > { %v1099_v52 = vpack.c.bf16 %v1067_v59, %v1064_v4 }
 0x44e   : > { %2004 = vmatprep.mubr.msk.bf16.mxu0 %vm1126_vm3, %v1099_v52 }
 0x44f   : > { %2005 = vmatmul.mubr.msk.bf16.gmra.mrb[40].mxu0 %vm1126_vm3, %v1100_v58 }
 0x450   : > { %v1990_v33 = vpop.f32.mrb[28].mxu1 }
 0x451   : > { %v1080_v30 = vpop.f32.mrb[29].mxu1 }
 0x452   : > { %v1991_v34 = vpop.f32.mrb[30].mxu1 }
 0x453   : > { %v1102_v43 = vpack.c.bf16 %v1991_v34, %v1990_v33  ;;  %v1083_v41 = vpop.f32.mrb[31].mxu1 }
 0x454   : > { %v1101_v9 = vpack.c.bf16 %v1083_v41, %v1080_v30 }
 0x456   : > { %2008 = vmatprep.mubr.msk.bf16.mxu0 %vm1126_vm3, %v1101_v9 }
 0x457   : > { %2009 = vmatmul.mubr.msk.bf16.gmra.mrb[44].mxu0 %vm1126_vm3, %v1102_v43 }
 0x512   : > { %v1998_v12 = vpop.f32.mrb[32].mxu0 }
 0x513   : > { %v1194_v1 = vadd.f32 %v1998_v12, %v1801_v38  ;;  %v1185_v20 = vpop.f32.mrb[33].mxu0 }
 0x514   : > { %v1999_v4 = vpop.f32.mrb[34].mxu0  ;;  %v1186_v58 = vadd.f32 %v1801_v38, %v1185_v20 }
 0x515   : > { %v1314_v50 = vadd.f32 %v2602_v28, %v1194_v1  ;;  %v1197_v59 = vadd.f32 %v1999_v4, %v1801_v38  ;;  %v1188_v52 = vpop.f32.mrb[35].mxu0 }
 0x516   : > { %v1189_v30 = vadd.f32 %v1801_v38, %v1188_v52  ;;  %v1312_v34 = vadd.f32 %v2591_v61, %v1186_v58 }
 0x517   : > { %v1315_v33 = vadd.f32 %v2584_v60, %v1197_v59  ;;  %1492 = vrot.lane.b32.xlu0 %v1314_v50, %s2145_s21 }
 0x518   : > { %v1313_v41 = vadd.f32 %v2578_v17, %v1189_v30 }
 0x519   : > { %1494 = vrot.lane.b32.xlu1 %v1315_v33, %s2145_s21 }
 0x51a   : > { %v2002_v43 = vpop.f32.mrb[36].mxu0 }
 0x51b   : > { %v1210_v9 = vadd.f32 %v2002_v43, %v1801_v38  ;;  %v1201_v12 = vpop.f32.mrb[37].mxu0  ;;  %1488 = vrot.lane.b32.xlu0 %v1312_v34, %s2145_s21 }
 0x51c   : > { %v2003_v28 = vpop.f32.mrb[38].mxu0  ;;  %v1202_v20 = vadd.f32 %v1801_v38, %v1201_v12 }
 0x51d   : > { %v1318_v1 = vadd.f32 %v2628_v19, %v1210_v9  ;;  %v1213_v4 = vadd.f32 %v2003_v28, %v1801_v38  ;;  %1490 = vrot.lane.b32.xlu1 %v1313_v41, %s2145_s21  ;;  %v1204_v60 = vpop.f32.mrb[39].mxu0 }
 0x51e   : > { %v1205_v61 = vadd.f32 %v1801_v38, %v1204_v60  ;;  %v1316_v58 = vadd.f32 %v2612_v2, %v1202_v20 }
 0x51f   : > { %v1319_v50 = vadd.f32 %v2598_v62, %v1213_v4  ;;  %1500 = vrot.lane.b32.xlu0 %v1318_v1, %s2145_s21 }
 0x520   : > { %v1317_v59 = vadd.f32 %v2593_v32, %v1205_v61 }
 0x521   : > { %1502 = vrot.lane.b32.xlu1 %v1319_v50, %s2145_s21 }
 0x522   : > { %v2006_v17 = vpop.f32.mrb[40].mxu0 }
 0x523   : > { %v1226_v52 = vadd.f32 %v2006_v17, %v1801_v38  ;;  %v1217_v33 = vpop.f32.mrb[41].mxu0  ;;  %1496 = vrot.lane.b32.xlu0 %v1316_v58, %s2145_s21  ;;  %v1407_v58 = vadd.f32 %v2702_v21, %v2425_v14 }
 0x524   : > { %v2007_v19 = vpop.f32.mrb[42].mxu0  ;;  %v1218_v34 = vadd.f32 %v1801_v38, %v1217_v33 }
 0x525   : > { %v1322_v30 = vadd.f32 %v2643_v57, %v1226_v52  ;;  %v1229_v43 = vadd.f32 %v2007_v19, %v1801_v38  ;;  %1498 = vrot.lane.b32.xlu1 %v1317_v59, %s2145_s21  ;;  %v1220_v62 = vpop.f32.mrb[43].mxu0 }
 0x526   : > { %v1221_v2 = vadd.f32 %v1801_v38, %v1220_v62  ;;  %v1320_v9 = vadd.f32 %v2638_v56, %v1218_v34  ;;  %v1602_v62 = vsel %vm1126_vm3, %v2480_v16, %v2656_v31  ;;  %v1600_v16 = vsel %vm1126_vm3, %v2488_v25, %v2663_v29 }
 0x527   : > { %v1323_v41 = vadd.f32 %v2614_v48, %v1229_v43  ;;  %1508 = vrot.lane.b32.xlu0 %v1322_v30, %s2145_s21  ;;  %v1606_v25 = vsel %vm1126_vm3, %v2508_v63, %v2671_v35  ;;  %v1604_v63 = vsel %vm1126_vm3, %v2500_v37, %v2679_v54  ;;  %v1610_v37 = vsel %vm1126_vm3, %v2524_v18, %v2687_v46 }
 0x528   : > { %v1321_v12 = vadd.f32 %v2607_v47, %v1221_v2  ;;  %v1608_v18 = vsel %vm1126_vm3, %v2516_v8, %v2695_v5 }
 0x529   : > { %1510 = vrot.lane.b32.xlu1 %v1323_v41, %s2145_s21 }
 0x52a   : > { %v2010_v32 = vpop.f32.mrb[44].mxu0 }
 0x52b   : > { %v1242_v28 = vadd.f32 %v2010_v32, %v1801_v38  ;;  %v1233_v1 = vpop.f32.mrb[45].mxu0  ;;  %1504 = vrot.lane.b32.xlu0 %v1320_v9, %s2145_s21  ;;  %v2942_v9 = vld [vmem:[#allocation5_spill] sm:$0xff] }
 0x52c   : > { %v2011_v57 = vpop.f32.mrb[46].mxu0  ;;  %v1234_v4 = vadd.f32 %v1801_v38, %v1233_v1  ;;  %v1603_v32 = vsel %vm1126_vm3, %v2942_v9, %v2658_v27  ;;  %v1614_v9 = vsel %vm1126_vm3, %v2540_v3, %v2704_v53 }
 0x52d   : > { %v1326_v20 = vadd.f32 %v2650_v11, %v1242_v28  ;;  %v1245_v60 = vadd.f32 %v2011_v57, %v1801_v38  ;;  %1506 = vrot.lane.b32.xlu1 %v1321_v12, %s2145_s21  ;;  %v1236_v48 = vpop.f32.mrb[47].mxu0  ;;  %v1406_v11 = vadd.f32 %v2700_v23, %v2421_v13 }
 0x52e   : > { %v1237_v56 = vadd.f32 %v1801_v38, %v1236_v48  ;;  %v1324_v61 = vadd.f32 %v2645_v22, %v1234_v4  ;;  %v2763_v22 = vpop.permute.xlu1 %1450 }
 0x52f   : > { %v1327_v50 = vadd.f32 %v2631_v15, %v1245_v60  ;;  %1516 = vrot.lane.b32.xlu0 %v1326_v20, %s2145_s21  ;;  %v2761_v15 = vpop.permute.xlu0 %1448  ;;  %v1601_v20 = vsel %vm1126_vm3, %v2491_v26, %v2666_v40  ;;  %v1607_v26 = vsel %vm1126_vm3, %v2511_v0, %v2674_v39  ;;  %v1605_v0 = vsel %vm1126_vm3, %v2503_v44, %v2682_v55 }
 0x530   : > { %v1325_v47 = vadd.f32 %v2624_v42, %v1237_v56  ;;  %v1611_v44 = vsel %vm1126_vm3, %v2527_v24, %v2690_v49  ;;  %v1609_v24 = vsel %vm1126_vm3, %v2519_v10, %v2698_v6  ;;  %v1612_v10 = vsel %vm1126_vm3, %v2532_v36, %v2761_v15 }
 0x531   : > { %1518 = vrot.lane.b32.xlu1 %v1327_v50, %s2145_s21 }
 0x532   : > { %v1559_v38 = vpop.permute.xlu1 %1558 }
 0x533   : > { %1512 = vrot.lane.b32.xlu0 %v1324_v61, %s2145_s21  ;;  %v1557_v42 = vpop.permute.xlu0 %1556 }
 0x535   : > { %1514 = vrot.lane.b32.xlu1 %v1325_v47, %s2145_s21 }
 0x536   : > { %v1555_v59 = vpop.permute.xlu1 %1554 }
 0x537   : > { %1580 = vrot.lane.b32.xlu0 %v1406_v11, %s2145_s21  ;;  %v1553_v17 = vpop.permute.xlu0 %1552 }
 0x539   : > { %1582 = vrot.lane.b32.xlu1 %v1407_v58, %s2145_s21 }
 0x53a   : > { %v1567_v23 = vpop.permute.xlu1 %1566 }
 0x53b   : > { %v1565_v13 = vpop.permute.xlu0 %1564 }
 0x53e   : > { %v1563_v33 = vpop.permute.xlu1 %1562 }
 0x53f   : > { %v1561_v52 = vpop.permute.xlu0 %1560 }
 0x542   : > { %v1575_v14 = vpop.permute.xlu1 %1574 }
 0x543   : > { %v1573_v19 = vpop.permute.xlu0 %1572 }
 0x546   : > { %v2767_v30 = vpop.permute.xlu1 %1570 }
 0x547   : > { %v2765_v21 = vpop.permute.xlu0 %1568 }
 0x54a   : > { %v2774_v43 = vpop.permute.xlu1 %1578 }
 0x54b   : > { %v2770_v34 = vpop.permute.xlu0 %1576 }
 0x589   : > { %v1493_v41 = vpop.permute.xlu0 %1492 }
 0x58a   : > { %v1618_v2 = vsel %vm724_vm2, %v1602_v62, %v1493_v41 }
 0x58b   : > { %v1635_v12 = vsel %vm1632_vm4, %v1618_v2, %v1557_v42  ;;  %v1495_v28 = vpop.permute.xlu1 %1494 }
 0x58c   : > { %1651 = vst [vmem:[%s2784_s18 + $0x10] sm:$0xff] %v1635_v12  ;;  %v1619_v1 = vsel %vm724_vm2, %v1603_v32, %v1495_v28 }
 0x58d   : > { %v1636_v31 = vsel %vm1632_vm4, %v1619_v1, %v1559_v38  ;;  %v1489_v57 = vpop.permute.xlu0 %1488 }
 0x58e   : > { %1652 = vst [vmem:[%s2784_s18 + $0x18] sm:$0xff] %v1636_v31  ;;  %v1616_v27 = vsel %vm724_vm2, %v1600_v16, %v1489_v57 }
 0x58f   : > { %v1633_v4 = vsel %vm1632_vm4, %v1616_v27, %v1553_v17  ;;  %v1491_v60 = vpop.permute.xlu1 %1490 }
 0x590   : > { %1649 = vst [vmem:[%s2784_s18] sm:$0xff] %v1633_v4  ;;  %v1617_v48 = vsel %vm724_vm2, %v1601_v20, %v1491_v60 }
 0x591   : > { %v1634_v29 = vsel %vm1632_vm4, %v1617_v48, %v1555_v59  ;;  %v1501_v50 = vpop.permute.xlu0 %1500 }
 0x592   : > { %1650 = vst [vmem:[%s2784_s18 + $0x8] sm:$0xff] %v1634_v29  ;;  %v1622_v56 = vsel %vm724_vm2, %v1606_v25, %v1501_v50 }
 0x593   : > { %v1639_v40 = vsel %vm1632_vm4, %v1622_v56, %v1565_v13  ;;  %v1503_v61 = vpop.permute.xlu1 %1502 }
 0x594   : > { %1655 = vst [vmem:[%s2784_s18 + $0x30] sm:$0xff] %v1639_v40  ;;  %v1623_v47 = vsel %vm724_vm2, %v1607_v26, %v1503_v61 }
 0x595   : > { %v1640_v35 = vsel %vm1632_vm4, %v1623_v47, %v1567_v23  ;;  %v1497_v11 = vpop.permute.xlu0 %1496 }
 0x596   : > { %1656 = vst [vmem:[%s2784_s18 + $0x38] sm:$0xff] %v1640_v35  ;;  %v1620_v58 = vsel %vm724_vm2, %v1604_v63, %v1497_v11 }
 0x597   : > { %v1637_v39 = vsel %vm1632_vm4, %v1620_v58, %v1561_v52  ;;  %v1499_v42 = vpop.permute.xlu1 %1498 }
 0x598   : > { %1653 = vst [vmem:[%s2784_s18 + $0x20] sm:$0xff] %v1637_v39  ;;  %v1621_v38 = vsel %vm724_vm2, %v1605_v0, %v1499_v42 }
 0x599   : > { %v1638_v54 = vsel %vm1632_vm4, %v1621_v38, %v1563_v33  ;;  %v1509_v17 = vpop.permute.xlu0 %1508 }
 0x59a   : > { %1654 = vst [vmem:[%s2784_s18 + $0x28] sm:$0xff] %v1638_v54  ;;  %v1626_v59 = vsel %vm724_vm2, %v1610_v37, %v1509_v17 }
 0x59b   : > { %v1643_v55 = vsel %vm1632_vm4, %v1626_v59, %v1573_v19  ;;  %v1511_v13 = vpop.permute.xlu1 %1510 }
 0x59c   : > { %1659 = vst [vmem:[%s2784_s18 + $0x50] sm:$0xff] %v1643_v55  ;;  %v1627_v23 = vsel %vm724_vm2, %v1611_v44, %v1511_v13 }
 0x59d   : > { %v1644_v46 = vsel %vm1632_vm4, %v1627_v23, %v1575_v14  ;;  %v1505_v52 = vpop.permute.xlu0 %1504 }
 0x59e   : > { %1660 = vst [vmem:[%s2784_s18 + $0x58] sm:$0xff] %v1644_v46  ;;  %v1624_v33 = vsel %vm724_vm2, %v1608_v18, %v1505_v52 }
 0x59f   : > { %v1641_v49 = vsel %vm1632_vm4, %v1624_v33, %v2765_v21  ;;  %v1507_v19 = vpop.permute.xlu1 %1506  ;;  %v1613_v21 = vsel %vm1126_vm3, %v2535_v45, %v2763_v22 }
 0x5a0   : > { %1657 = vst [vmem:[%s2784_s18 + $0x40] sm:$0xff] %v1641_v49  ;;  %v1625_v8 = vsel %vm724_vm2, %v1609_v24, %v1507_v19 }
 0x5a1   : > { %v1642_v5 = vsel %vm1632_vm4, %v1625_v8, %v2767_v30  ;;  %v1517_v14 = vpop.permute.xlu0 %1516 }
 0x5a2   : > { %1658 = vst [vmem:[%s2784_s18 + $0x48] sm:$0xff] %v1642_v5  ;;  %v1630_v15 = vsel %vm724_vm2, %v1614_v9, %v1517_v14 }
 0x5a3   : > { %v1519_v62 = vpop.permute.xlu1 %1518 }
 0x5a5   : > { %v1513_v6 = vpop.permute.xlu0 %1512 }
 0x5a6   : > { %v1628_v41 = vsel %vm724_vm2, %v1612_v10, %v1513_v6 }
 0x5a7   : > { %v1645_v2 = vsel %vm1632_vm4, %v1628_v41, %v2770_v34  ;;  %v1515_v30 = vpop.permute.xlu1 %1514  ;;  %v1615_v34 = vsel %vm1126_vm3, %v2543_v7, %v2706_v51 }
 0x5a8   : > { %1661 = vst [vmem:[%s2784_s18 + $0x60] sm:$0xff] %v1645_v2  ;;  %v1629_v36 = vsel %vm724_vm2, %v1613_v21, %v1515_v30  ;;  %v1631_v3 = vsel %vm724_vm2, %v1615_v34, %v1519_v62 }
 0x5a9   : > { %v1646_v45 = vsel %vm1632_vm4, %v1629_v36, %v2774_v43  ;;  %v1581_v22 = vpop.permute.xlu0 %1580 }
 0x5aa   : > { %1662 = vst [vmem:[%s2784_s18 + $0x68] sm:$0xff] %v1646_v45  ;;  %v1647_v32 = vsel %vm1632_vm4, %v1630_v15, %v1581_v22 }
 0x5ab   : > { %1663 = vst [vmem:[%s2784_s18 + $0x70] sm:$0xff] %v1647_v32  ;;  %v1583_v53 = vpop.permute.xlu1 %1582 }
 0x5ac   : > { %v1648_v43 = vsel %vm1632_vm4, %v1631_v3, %v1583_v53 }
 0x5ad   : > { %1664 = vst [vmem:[%s2784_s18 + $0x78] sm:$0xff] %v1648_v43 }
 0x5ae   : > { %2094 = shalt.err (!%p2091_p3)
}
 0x5af   : > { %s2095_s14 = scalar_lea.hbm %s2879_s22, 2048  ;;  %s2099_s17 = scalar_lea.hbm %s2937_s7, 4096 }
 0x5b0   : > { %p2096_p4 = scmp.ne.s32.totalorder %s2879_s22, %s2095_s14  ;;  %p2100_p9 = scmp.lt.u32.totalorder %s2879_s22, %s2937_s7 }
 0x5b1   : > { %p2101_p10 = scmp.lt.u32.totalorder %s2099_s17, %s2095_s14  ;;  %p2103_p12 = scmp.lt.u32.totalorder %s2095_s14, %s2879_s22 }
 0x5b2   : > { %p2097_p7 = pnand %p2096_p4, %p2229_p5 }
 0x5b3   : > { %p2102_p11 = por %p2101_p10, %p2100_p9 }
 0x5b4   : > { %p2098_p8 = pneg %p2097_p7 }
 0x5b5   : > { %p2104_p13 = por %p2103_p12, %p2102_p11 }
 0x5b7   : > { %p2105_p0 = pnand %p2104_p13, %p2098_p8 }
 0x5b9   : > { %2108 = shalt.err (!%p2105_p0)
}
 0x5ba   : > { %s2149_s28 = smov 128   ;;  %s2150_s21 = smov 8  }
 0x5bb   : > { %2013 = dma.vmem_to_hbm [thread:$0]  (%p2229_p5), %s2881_s20, 2048, %s2879_s22, %s2889_s23, %s2149_s28, %s2149_s28, %s2150_s21  }
 0x5bc PF: > { %p2019_p1 = scmp.ge.s32.totalorder %s2143_s27, 2  ;;  %s1694_s29 = sand.u32 1, %s2131_s24  }
 0x5bd   : > { %s1695_s8 = scalar_lea.sflag [#allocation3], %s1694_s29 }
 0x5be   : > { %p2016_p2 = pnand %p2019_p1, %p2233_p6 }
 0x5c0   : > { %2126 = dma.done.wait (!%p2016_p2), %s1695_s8, 2048  }
 0x5c1   : > { %2128 = vsyncadd (!%p2016_p2), %s1695_s8, 4294965248  ;;  %p17_p3 = scmp.ge.s32.totalorder %s2216_s30, 4   ;;  %s2943_s24 = smov %s2135_s25 }
 0x5c2   : > { %s2944_s25 = smov %s2139_s26  ;;  %s2945_s26 = smov %s2227_s10 }
 0x5c3   : > { %s2946_s27 = smov %s2216_s30  ;;  %19 = sbr.rel (!%p17_p3) target bundleno = 3 (0x3), region = 86 }
 0x5ca   :  { %1700 = vsyncpa [#allocation3], 1 }
 0x5cb   :  { %1702 = vsyncpa [#allocation3 + $0x1], 1 }

</bundles_post_ra>
